<compile_context>
chip_gen: v6e
topology: v6e:2x2x1
jax: 0.10.0
libtpu: 0.0.40
codegen_flags: <defaults>
</compile_context>

<pallas_src>
import functools

import jax
import jax.numpy as jnp
import numpy as np
from jax.experimental import pallas as pl
from jax.experimental.pallas import tpu as pltpu

VMEM = pltpu.MemorySpace.VMEM
SMEM = pltpu.MemorySpace.SMEM
BN_EPS = 1e-5


# ----------------------------------------------------------------------------
# pltpu.roll convention probe (runs once at init, outside the hot path)
# ----------------------------------------------------------------------------
@functools.lru_cache(maxsize=None)
def _roll_shift_sign():
    """Returns sign s.t. pltpu.roll(x, (sign*s) % n, ax) == x[(p + s) % n]."""
    def kern(x_ref, o_ref):
        o_ref[...] = pltpu.roll(x_ref[...], 1, 1)

    x = jnp.broadcast_to(jnp.arange(128, dtype=jnp.float32), (8, 128))
    y = pl.pallas_call(
        kern,
        out_shape=jax.ShapeDtypeStruct((8, 128), jnp.float32),
        in_specs=[pl.BlockSpec(memory_space=VMEM)],
        out_specs=pl.BlockSpec(memory_space=VMEM),
    )(x)
    # np.roll convention -> y[0,0] == 127 -> use shift = -s ; otherwise +s.
    return 1 if float(y[0, 0]) == 1.0 else -1


# ----------------------------------------------------------------------------
# Fully fused Resnet kernel
# ----------------------------------------------------------------------------
def _resnet_kernel(mask_ref, x_ref, w_ref, o_ref, *,
                   N, H, W, Cin, Cmid, Cout, roll_sign):
    """mask: (9, N, HW) f32   x: (Cin, N, HW)   w: flat f32 params in SMEM
    o: (Cout, N, HW).  Activations are Python lists of (N, HW) blocks."""
    HW = H * W
    f32 = jnp.float32

    def shift_mask(blk, tap):
        # out[p] = blk[p + s] for in-image taps, 0 outside (zero padding).
        dh, dw = divmod(tap, 3)
        s = (dh - 1) * W + (dw - 1)
        if s == 0:
            return blk
        rolled = pltpu.roll(blk, (roll_sign * s) % HW, 1)
        return rolled * mask_ref[tap]

    def conv3x3_dense(xs, Ci, Co, w_off, b_off):
        accs = [jnp.full((N, HW), w_ref[b_off + co], f32) for co in range(Co)]
        for tap in range(9):
            sh = [shift_mask(xs[ci], tap) for ci in range(Ci)]
            for ci in range(Ci):
                for co in range(Co):
                    accs[co] = accs[co] + sh[ci] * w_ref[
                        w_off + (tap * Ci + ci) * Co + co]
        return accs

    def depthwise3x3(xs, C, wd_off, bd_off):
        accs = [jnp.full((N, HW), w_ref[bd_off + c], f32) for c in range(C)]
        for tap in range(9):
            for c in range(C):
                accs[c] = accs[c] + shift_mask(xs[c], tap) * w_ref[
                    wd_off + tap * C + c]
        return accs

    def pointwise1x1(ys, C, ws_off, bs_off):
        accs = [jnp.full((N, HW), w_ref[bs_off + co], f32) for co in range(C)]
        for ci in range(C):
            for co in range(C):
                accs[co] = accs[co] + ys[ci] * w_ref[ws_off + ci * C + co]
        return accs

    def deepse(xs, C, off):
        # x + s_conv(relu6(bn(d_conv(x)))), BN folded into d_conv weights.
        wd_off = off
        bd_off = wd_off + 9 * C
        ws_off = bd_off + C
        bs_off = ws_off + C * C
        d = depthwise3x3(xs, C, wd_off, bd_off)
        y = [jnp.clip(v, 0.0, 6.0) for v in d]
        s = pointwise1x1(y, C, ws_off, bs_off)
        return [xs[c] + s[c] for c in range(C)]

    x = [x_ref[c].astype(f32) for c in range(Cin)]

    w_in_off = 0
    b_in_off = 9 * Cin * Cmid
    blk_off = b_in_off + Cmid
    layer_sz = 9 * Cmid + Cmid + Cmid * Cmid + Cmid

    # conv_in
    x = conv3x3_dense(x, Cin, Cmid, w_in_off, b_in_off)

    # 4x Resblock_ds: x = x + relu(deepse(relu(deepse(x))))
    for b in range(4):
        skip = x
        h = [jnp.maximum(v, 0.0)
             for v in deepse(x, Cmid, blk_off + (2 * b) * layer_sz)]
        t = [jnp.maximum(v, 0.0)
             for v in deepse(h, Cmid, blk_off + (2 * b + 1) * layer_sz)]
        x = [skip[c] + t[c] for c in range(Cmid)]

    # conv_out
    w_out_off = blk_off + 8 * layer_sz
    b_out_off = w_out_off + 9 * Cmid * Cout
    out = conv3x3_dense(x, Cmid, Cout, w_out_off, b_out_off)
    for co in range(Cout):
        o_ref[co] = out[co].astype(o_ref.dtype)


# ----------------------------------------------------------------------------
# Host-side packing helpers + wrapper
# ----------------------------------------------------------------------------
def _pack_params(params):
    """Flatten all conv weights/biases (BN folded) into one f32 vector."""
    parts = [params['conv_in_w'].reshape(-1), params['conv_in_b'].reshape(-1)]
    for p1, p2 in params['blocks']:
        for p in (p1, p2):
            wd, bd, gamma, beta, mean, var, ws, bs = p
            scale = gamma / jnp.sqrt(var + BN_EPS)
            shift = beta - mean * scale
            wd_f = wd * scale                       # (3,3,C)
            bd_f = bd * scale + shift               # (C,)
            parts += [wd_f.reshape(-1), bd_f.reshape(-1),
                      ws.reshape(-1), bs.reshape(-1)]
    parts += [params['conv_out_w'].reshape(-1),
              params['conv_out_b'].reshape(-1)]
    return jnp.concatenate(parts).astype(jnp.float32)


def _border_masks(H, W, N):
    """Static (9, N, H*W) validity masks for the 9 conv taps (zero padding)."""
    hh, ww = np.meshgrid(np.arange(H), np.arange(W), indexing='ij')
    m = np.zeros((9, N, H * W), np.float32)
    for tap in range(9):
        dh, dw = divmod(tap, 3)
        valid = ((hh + dh - 1 >= 0) & (hh + dh - 1 < H) &
                 (ww + dw - 1 >= 0) & (ww + dw - 1 < W))
        m[tap] = valid.reshape(-1)[None, :].astype(np.float32)
    return jnp.asarray(m)


def resnet_forward(x_nchw, params):
    N, Cin, H, W = x_nchw.shape
    Cmid = params['conv_in_w'].shape[3]
    Cout = params['conv_out_w'].shape[3]
    HW = H * W

    x_cnhw = jnp.transpose(x_nchw, (1, 0, 2, 3)).reshape(Cin, N, HW)
    wflat = _pack_params(params)
    masks = _border_masks(H, W, N)

    kernel = functools.partial(
        _resnet_kernel, N=N, H=H, W=W, Cin=Cin, Cmid=Cmid, Cout=Cout,
        roll_sign=_roll_shift_sign())

    out = pl.pallas_call(
        kernel,
        out_shape=jax.ShapeDtypeStruct((Cout, N, HW), x_nchw.dtype),
        in_specs=[pl.BlockSpec(memory_space=VMEM),   # border masks
                  pl.BlockSpec(memory_space=VMEM),   # activations
                  pl.BlockSpec(memory_space=SMEM)],  # packed conv params
        out_specs=pl.BlockSpec(memory_space=VMEM),
    )(masks, x_cnhw, wflat)

    return jnp.transpose(out.reshape(Cout, N, H, W), (1, 0, 2, 3))


# ----------------------------------------------------------------------------
# Pure-JAX reference (correctness check only)
# ----------------------------------------------------------------------------
def _conv3x3_ref(x, w, b):
    return jax.lax.conv_general_dilated(
        x, w, (1, 1), 'SAME',
        dimension_numbers=('NHWC', 'HWIO', 'NHWC')) + b


def _deepse_ref(x, p):
    wd, bd, gamma, beta, mean, var, ws, bs = p
    C = x.shape[-1]
    d = jax.lax.conv_general_dilated(
        x, wd.reshape(3, 3, 1, C), (1, 1), 'SAME',
        dimension_numbers=('NHWC', 'HWIO', 'NHWC'),
        feature_group_count=C) + bd
    scale = gamma / jnp.sqrt(var + BN_EPS)
    shift = beta - mean * scale
    y = jnp.clip(d * scale + shift, 0.0, 6.0)
    s = jnp.einsum('nhwc,cd->nhwd', y, ws) + bs
    return x + s


def resnet_ref(x_nchw, params):
    x = jnp.transpose(x_nchw, (0, 2, 3, 1))
    x = _conv3x3_ref(x, params['conv_in_w'], params['conv_in_b'])
    for p1, p2 in params['blocks']:
        h = jnp.maximum(_deepse_ref(x, p1), 0.0)
        x = x + jnp.maximum(_deepse_ref(h, p2), 0.0)
    x = _conv3x3_ref(x, params['conv_out_w'], params['conv_out_b'])
    return jnp.transpose(x, (0, 3, 1, 2))


# ----------------------------------------------------------------------------
# Deterministic parameter initialization
# ----------------------------------------------------------------------------
def init_deepse_params(key, c):
    ks = jax.random.split(key, 8)
    wd = 0.3 * jax.random.normal(ks[0], (3, 3, c), jnp.float32)
    bd = 0.1 * jax.random.normal(ks[1], (c,), jnp.float32)
    gamma = jax.random.uniform(ks[2], (c,), jnp.float32, 0.5, 1.5)
    beta = 0.1 * jax.random.normal(ks[3], (c,), jnp.float32)
    mean = 0.1 * jax.random.normal(ks[4], (c,), jnp.float32)
    var = jax.random.uniform(ks[5], (c,), jnp.float32, 0.5, 1.5)
    ws = 0.3 * jax.random.normal(ks[6], (c, c), jnp.float32)
    bs = 0.1 * jax.random.normal(ks[7], (c,), jnp.float32)
    return (wd, bd, gamma, beta, mean, var, ws, bs)


def init_params(key, in_c, out_c):
    mid = in_c - 1
    k_in, k_out, k_blk = jax.random.split(key, 3)
    kiw, kib = jax.random.split(k_in)
    kow, kob = jax.random.split(k_out)
    bkeys = jax.random.split(k_blk, 8)
    return {
        'conv_in_w': 0.3 * jax.random.normal(kiw, (3, 3, in_c, mid), jnp.float32),
        'conv_in_b': 0.1 * jax.random.normal(kib, (mid,), jnp.float32),
        'conv_out_w': 0.3 * jax.random.normal(kow, (3, 3, mid, out_c), jnp.float32),
        'conv_out_b': 0.1 * jax.random.normal(kob, (out_c,), jnp.float32),
        'blocks': [
            (init_deepse_params(bkeys[2 * i], mid),
             init_deepse_params(bkeys[2 * i + 1], mid))
            for i in range(4)
        ],
    }


# ----------------------------------------------------------------------------
if __name__ == "__main__":
    key = jax.random.PRNGKey(0)
    kp, kx = jax.random.split(key)

    in_c, out_c = 4, 4
    N, H, W = 2, 16, 16
    params = init_params(kp, in_c, out_c)
    x = jax.random.normal(kx, (N, in_c, H, W), jnp.float32)

    _roll_shift_sign()   # probe pltpu.roll convention once, outside jit

    fwd = jax.jit(lambda xx: resnet_forward(xx, params))
    out = jax.block_until_ready(fwd(x))

    assert out.shape == (N, out_c, H, W), out.shape
    ref = resnet_ref(x, params)
    np.testing.assert_allclose(np.asarray(out), np.asarray(ref),
                               atol=2e-4, rtol=2e-4)
    print("KERNEL_OK")
</pallas_src>

<mosaic_0001>
module attributes {stable_mosaic.version = 11 : i64} {
  func.func @kern(%arg0: memref<8x128xf32, #tpu.memory_space<vmem>>, %arg1: memref<8x128xf32, #tpu.memory_space<vmem>>) attributes {dimension_semantics = [], scalar_prefetch = 0 : i64, scratch_operands = 0 : i64, tpu.core_type = #tpu.core_type<tc>} {
    %c0 = arith.constant 0 : index
    %c0_0 = arith.constant 0 : index
    %0 = vector.load %arg0[%c0, %c0_0] : memref<8x128xf32, #tpu.memory_space<vmem>>, vector<8x128xf32>
    %c1_i32 = arith.constant 1 : i32
    %1 = tpu.dynamic_rotate %0 by %c1_i32 dim 1 : vector<8x128xf32>, i32 -> vector<8x128xf32>
    %c0_1 = arith.constant 0 : index
    %c0_2 = arith.constant 0 : index
    %2 = vector.load %arg1[%c0_1, %c0_2] : memref<8x128xf32, #tpu.memory_space<vmem>>, vector<8x128xf32>
    tpu.vector_store %arg1[%c0_1, %c0_2], %1 {strides = array<i32>} : memref<8x128xf32, #tpu.memory_space<vmem>>, vector<8x128xf32>,
    return
  }
}

</mosaic_0001>

<bundles_post_ra>
// kernel: tpu_custom_call.1
= control target key start
LH: loop header
LB: loop body
LE: loop exit
PB: predicated region body
PF: predicated region fallthrough
CT: control target
= control target key end

     0   :  { %6 = vsyncpa [#allocation3], 0  ;;  %s106_s0 = inlined_call_operand.hbm [shape: f32[8,128], index: 0, kind: input, shape index: {}]   ;;  %s107_s1 = inlined_call_operand.hbm [shape: f32[8,128], index: 1, kind: output, shape index: {}]  }
   0x1   :  { %7 = vsyncpa [#allocation4], 0  ;;  %s87_s6 = smov [#allocation2]  }
   0x2   :  { %s14_s7 = sshll.u32 %s87_s6, 4  ;;  %s15_s7 = int_to_ptr.vmem [resolvable:$true] %s14_s7 }
   0x3   :  { %s51_s8 = scalar_lea.vmem %s15_s7, 128  ;;  %p56_p1 = scmp.lt.s32.totalorder %s15_s7, %s15_s7 }
   0x4   :  { %p52_p0 = scmp.ne.s32.totalorder %s15_s7, %s51_s8  ;;  %p57_p2 = scmp.lt.s32.totalorder %s51_s8, %s51_s8 }
   0x6   :  { %p58_p3 = por %p57_p2, %p56_p1 }
   0x8   :  { %p59_p4 = pnand %p58_p3, %p52_p0 }
   0xa   :  { %62 = shalt.err (!%p59_p4)
}
   0xb   :  { %17 = dma.hbm_to_vmem [thread:$0]  %s106_s0, 128, %s15_s7, [#allocation3]  }
   0xc   :  { %83 = dma.done.wait [#allocation3], 128  }
   0xd   :  { %84 = vsyncadd [#allocation3], 4294967168  ;;  %v21_v0 = vld [vmem:[#allocation2] sm:$0xff]  ;;  %s88_s11 = smov 1   ;;  %s89_s12 = smov [#allocation5]  }
   0xe   :  { %22 = vrot.lane.b32.xlu0 %v21_v0, %s88_s11  ;;  %s31_s13 = sshll.u32 %s89_s12, 4  ;;  %s32_s13 = int_to_ptr.vmem [resolvable:$true] %s31_s13 }
   0xf   :  { %s63_s14 = scalar_lea.vmem %s32_s13, 128  ;;  %p68_p6 = scmp.lt.s32.totalorder %s32_s13, %s32_s13 }
  0x10   :  { %p64_p5 = scmp.ne.s32.totalorder %s32_s13, %s63_s14  ;;  %p69_p7 = scmp.lt.s32.totalorder %s63_s14, %s63_s14 }
  0x12   :  { %p70_p8 = por %p69_p7, %p68_p6 }
  0x14   :  { %p71_p9 = pnand %p70_p8, %p64_p5 }
  0x80   :  { %v23_v1 = vpop.permute.xlu0 %22 }
  0x81   :  { %24 = vst [vmem:[#allocation5] sm:$0xff] %v23_v1 }
  0x82   :  { %74 = shalt.err (!%p71_p9)
}
  0x83   :  { %34 = dma.vmem_to_hbm [thread:$0]  %s32_s13, 128, %s107_s1, [#allocation4]  }
  0x84   :  { %85 = dma.done.wait [#allocation4], 128  }
  0x85   :  { %86 = vsyncadd [#allocation4], 4294967168 }
  0x86   :  { %38 = vsyncpa [#allocation3], 1 }
  0x87   :  { %39 = vsyncpa [#allocation4], 1 }

</bundles_post_ra>
